<compile_context>
chip_gen: v7x
topology: tpu7x:2x2x1
jax: 0.10.0
libtpu: 0.0.40
codegen_flags: <defaults>
</compile_context>

<pallas_src>
import jax
import jax.numpy as jnp
from jax.experimental import pallas as pl
from jax.experimental.pallas import tpu as pltpu


def _broken_model_kernel(xt_ref, w_ref, lin_ref, quad_ref, o_ref):
    d = xt_ref.shape[0]
    xt = xt_ref[...].astype(jnp.float32)          # (d, TB)  samples on lanes
    w = w_ref[...]                                # (R, d)   [B ; S@B ; c1^T S B ; 0]

    # One tiny MXU matmul: rows 0..d-1 = B x, rows d..d+ns-1 = breaking scalars,
    # row d+ns = sum_k c1_k * bs_k (linear coeffs folded into the weight).
    y = jnp.dot(w, xt, preferred_element_type=jnp.float32)   # (R, TB)

    # x^T B x per sample (sublane reduction over the first d rows).
    m2 = jnp.sum(y[:d, :] * xt, axis=0, keepdims=True)       # (1, TB)

    # Breaking terms via masked full-sublane reduction (no misaligned slicing):
    #   lin_mask has 1.0 on the folded-linear row, quad_mask has c2_k on spurion rows.
    lin_mask = lin_ref[...]                       # (R, 1)
    quad_mask = quad_ref[...]                     # (R, 1)
    brk = jnp.sum(y * lin_mask + (y * y) * quad_mask, axis=0, keepdims=True)  # (1, TB)

    o_ref[...] = (m2 * m2 + 15.0 * m2 + brk).astype(o_ref.dtype)


def broken_model_forward(x, bi_tensor, spurions, coeffs, coeffs_2):
    """Pallas implementation of broken_model.forward for batched x of shape (batch, d)."""
    batch, d = x.shape
    n_spur = spurions.shape[0]

    b = bi_tensor.astype(jnp.float32)                         # (d, d)
    s = spurions.astype(jnp.float32)                          # (n_spur, d)
    sb = s @ b                                                # row k: s_k^T B
    c1 = jnp.asarray([coeffs[k % len(coeffs)] for k in range(n_spur)], jnp.float32)
    c2 = jnp.asarray([coeffs_2[k % len(coeffs_2)] for k in range(n_spur)], jnp.float32)
    lin_row = c1[None, :] @ sb                                # (1, d): sum_k c1_k s_k^T B

    r_real = d + n_spur + 1
    r = ((r_real + 7) // 8) * 8                               # pad rows to sublane multiple
    w = jnp.concatenate(
        [b, sb, lin_row, jnp.zeros((r - r_real, d), jnp.float32)], axis=0)   # (r, d)

    lin_mask = jnp.zeros((r, 1), jnp.float32).at[d + n_spur, 0].set(1.0)
    quad_mask = jnp.zeros((r, 1), jnp.float32).at[d:d + n_spur, 0].set(c2)

    # Batch tiling: samples live on the 128-lane axis. Big tiles (<=2048) and at
    # least 2 tiles when the batch allows, so "parallel" spans both v7x TCs.
    lane = 128
    if batch <= 2 * lane:
        tb = lane
    else:
        half = (batch + 1) // 2
        tb = min(2048, ((half + lane - 1) // lane) * lane)
    pb = ((batch + tb - 1) // tb) * tb
    grid = pb // tb

    # Only the tiny (d, batch) transposed view gets tail-padded (no full (batch, d)
    # pad copy in the original layout).
    xt = jnp.pad(x.astype(jnp.float32).T, ((0, 0), (0, pb - batch)))   # (d, pb)

    out = pl.pallas_call(
        _broken_model_kernel,
        out_shape=jax.ShapeDtypeStruct((1, pb), jnp.float32),
        grid=(grid,),
        in_specs=[
            pl.BlockSpec((d, tb), lambda i: (0, i)),     # x^T batch tile (lane-dense)
            pl.BlockSpec((r, d), lambda i: (0, 0)),      # fused weight (tiny, resident)
            pl.BlockSpec((r, 1), lambda i: (0, 0)),      # linear-term row selector
            pl.BlockSpec((r, 1), lambda i: (0, 0)),      # quadratic coeffs per row
        ],
        out_specs=pl.BlockSpec((1, tb), lambda i: (0, i)),   # lane-dense output block
        compiler_params=pltpu.CompilerParams(
            dimension_semantics=("parallel",),               # shards tiles across TCs
        ),
        cost_estimate=pl.CostEstimate(
            flops=2 * pb * d * r,
            bytes_accessed=4 * (pb * d + pb + r * d + 2 * r),
            transcendentals=0,
        ),
    )(xt, w, lin_mask, quad_mask)

    return out[0, :batch]


def reference_forward(x, bi_tensor, spurions, coeffs, coeffs_2):
    """Pure-JAX reference mirroring the PyTorch broken_model.forward exactly."""
    m2 = jnp.einsum('bi,ij,bj->b', x, bi_tensor, x)
    out = m2 ** 2 + 15.0 * m2
    for k in range(spurions.shape[0]):
        bs = jnp.einsum('i,ij,bj->b', spurions[k], bi_tensor, x)
        out = out + coeffs[k % len(coeffs)] * bs + coeffs_2[k % len(coeffs_2)] * bs ** 2
    return out


if __name__ == "__main__":
    BATCH, DINPUT, N_SPUR = 8, 4, 3

    key = jax.random.PRNGKey(0)
    k1, k2, k3 = jax.random.split(key, 3)
    x = jax.random.normal(k1, (BATCH, DINPUT), jnp.float32)
    bi = jax.random.normal(k2, (DINPUT, DINPUT), jnp.float32)
    bi = (bi + bi.T) * 0.5   # matches init='rand' symmetrization in __init__
    spurions = jax.random.normal(k3, (N_SPUR, DINPUT), jnp.float32)

    coeffs = [20.9983, -23.2444, 3.0459, 12.7176, -17.4378,
              1.4378, 10.1877, 15.889, -11.5178, -4.3926]
    coeffs_2 = [-0.8431, 5.7529, 19.0048, 3.2927, -14.946,
                5.6997, -5.9202, -10.5052, 2.6883, 16.5809]

    out = broken_model_forward(x, bi, spurions, coeffs, coeffs_2)
    out = jax.block_until_ready(out)

    ref = reference_forward(x, bi, spurions, coeffs, coeffs_2)
    assert jnp.allclose(out, ref, rtol=1e-3, atol=1e-3), (out, ref)

    print("KERNEL_OK")
</pallas_src>

<mosaic_0001>
module attributes {stable_mosaic.version = 11 : i64} {
  func.func @_broken_model_kernel(%arg0: i32, %arg1: memref<4x128xf32, #tpu.memory_space<vmem>>, %arg2: memref<8x4xf32, #tpu.memory_space<vmem>>, %arg3: memref<8x1xf32, #tpu.memory_space<vmem>>, %arg4: memref<8x1xf32, #tpu.memory_space<vmem>>, %arg5: memref<1x128xf32, #tpu.memory_space<vmem>>) attributes {dimension_semantics = [#tpu.dimension_semantics<parallel>], iteration_bounds = array<i64: 1>, scalar_prefetch = 0 : i64, scratch_operands = 0 : i64, tpu.core_type = #tpu.core_type<tc>, window_params = [{transform_indices = @transform_0, window_bounds = array<i64: 4, 128>}, {pipeline_mode = #tpu.pipeline_mode<synchronous>, transform_indices = @transform_1, window_bounds = array<i64: 8, 4>}, {pipeline_mode = #tpu.pipeline_mode<synchronous>, transform_indices = @transform_2, window_bounds = array<i64: 8, 1>}, {pipeline_mode = #tpu.pipeline_mode<synchronous>, transform_indices = @transform_3, window_bounds = array<i64: 8, 1>}, {transform_indices = @transform_4, window_bounds = array<i64: 1, 128>}]} {
    %c0 = arith.constant 0 : index
    %c0_0 = arith.constant 0 : index
    %0 = vector.load %arg1[%c0, %c0_0] : memref<4x128xf32, #tpu.memory_space<vmem>>, vector<4x128xf32>
    %c0_1 = arith.constant 0 : index
    %c0_2 = arith.constant 0 : index
    %1 = vector.load %arg2[%c0_1, %c0_2] : memref<8x4xf32, #tpu.memory_space<vmem>>, vector<8x4xf32>
    %cst = arith.constant dense<0.000000e+00> : vector<8x128xf32>
    %2 = tpu.matmul %1, %0, %cst {dimension_numbers = #tpu.dot_dimension_numbers<[1], [0], [0], [1], [0, 0, 1, 1], [], []>} : vector<8x4xf32>, vector<4x128xf32>, vector<8x128xf32> -> vector<8x128xf32>
    %3 = vector.extract_strided_slice %2 {offsets = [0, 0], sizes = [4, 128], strides = [1, 1]} : vector<8x128xf32> to vector<4x128xf32>
    %4 = arith.mulf %3, %0 : vector<4x128xf32>
    %cst_3 = arith.constant dense<0.000000e+00> : vector<128xf32>
    %5 = vector.multi_reduction <add>, %4, %cst_3 [0] : vector<4x128xf32> to vector<128xf32>
    %6 = vector.shape_cast %5 : vector<128xf32> to vector<1x128xf32>
    %c0_4 = arith.constant 0 : index
    %c0_5 = arith.constant 0 : index
    %7 = vector.load %arg3[%c0_4, %c0_5] : memref<8x1xf32, #tpu.memory_space<vmem>>, vector<8x1xf32>
    %c0_6 = arith.constant 0 : index
    %c0_7 = arith.constant 0 : index
    %8 = vector.load %arg4[%c0_6, %c0_7] : memref<8x1xf32, #tpu.memory_space<vmem>>, vector<8x1xf32>
    %9 = vector.broadcast %7 : vector<8x1xf32> to vector<8x128xf32>
    %10 = arith.mulf %2, %9 : vector<8x128xf32>
    %11 = arith.mulf %2, %2 : vector<8x128xf32>
    %12 = vector.broadcast %8 : vector<8x1xf32> to vector<8x128xf32>
    %13 = arith.mulf %11, %12 : vector<8x128xf32>
    %14 = arith.addf %10, %13 : vector<8x128xf32>
    %cst_8 = arith.constant dense<0.000000e+00> : vector<128xf32>
    %15 = vector.multi_reduction <add>, %14, %cst_8 [0] : vector<8x128xf32> to vector<128xf32>
    %16 = vector.shape_cast %15 : vector<128xf32> to vector<1x128xf32>
    %17 = arith.mulf %6, %6 : vector<1x128xf32>
    %cst_9 = arith.constant 1.500000e+01 : f32
    %18 = vector.broadcast %cst_9 : f32 to vector<1x128xf32>
    %19 = arith.mulf %18, %6 : vector<1x128xf32>
    %20 = arith.addf %17, %19 : vector<1x128xf32>
    %21 = arith.addf %20, %16 : vector<1x128xf32>
    %c0_10 = arith.constant 0 : index
    %c0_11 = arith.constant 0 : index
    %22 = vector.load %arg5[%c0_10, %c0_11] : memref<1x128xf32, #tpu.memory_space<vmem>>, vector<1x128xf32>
    tpu.vector_store %arg5[%c0_10, %c0_11], %21 {strides = array<i32>} : memref<1x128xf32, #tpu.memory_space<vmem>>, vector<1x128xf32>,
    return
  }
  func.func @transform_0(%arg0: i32) -> (i32, i32) {
    %c0_i32 = arith.constant 0 : i32
    %c0_i32_0 = arith.constant 0 : i32
    return %c0_i32, %arg0 : i32, i32
  }
  func.func @transform_1(%arg0: i32) -> (i32, i32) {
    %c0_i32 = arith.constant 0 : i32
    %c0_i32_0 = arith.constant 0 : i32
    %c0_i32_1 = arith.constant 0 : i32
    return %c0_i32, %c0_i32_0 : i32, i32
  }
  func.func @transform_2(%arg0: i32) -> (i32, i32) {
    %c0_i32 = arith.constant 0 : i32
    %c0_i32_0 = arith.constant 0 : i32
    %c0_i32_1 = arith.constant 0 : i32
    return %c0_i32, %c0_i32_0 : i32, i32
  }
  func.func @transform_3(%arg0: i32) -> (i32, i32) {
    %c0_i32 = arith.constant 0 : i32
    %c0_i32_0 = arith.constant 0 : i32
    %c0_i32_1 = arith.constant 0 : i32
    return %c0_i32, %c0_i32_0 : i32, i32
  }
  func.func @transform_4(%arg0: i32) -> (i32, i32) {
    %c0_i32 = arith.constant 0 : i32
    %c0_i32_0 = arith.constant 0 : i32
    return %c0_i32, %arg0 : i32, i32
  }
}

</mosaic_0001>

<bundles_post_ra>
// kernel: tpu_custom_call.1
= control target key start
LH: loop header
LB: loop body
LE: loop exit
PB: predicated region body
PF: predicated region fallthrough
CT: control target
= control target key end

     0   :  { %vm24_vm0 = vcmask 1043456   ;;  %v185_v2 = vmov 0.0   ;;  %vm186_vm1 = vmmov 0   ;;  %vm20_vm2 = vcmask 31744   ;;  %s240_s0 = inlined_call_operand.vmem [shape: f32[4,128], index: 0, kind: input, shape index: {}]   ;;  %s241_s1 = inlined_call_operand.vmem [shape: f32[8,4], index: 1, kind: input, shape index: {}]   ;;  %s242_s2 = inlined_call_operand.vmem [shape: f32[8,1], index: 2, kind: input, shape index: {}]   ;;  %s243_s3 = inlined_call_operand.vmem [shape: f32[8,1], index: 3, kind: input, shape index: {}]   ;;  %s244_s4 = inlined_call_operand.hbm [shape: f32[1,128], index: 4, kind: output, shape index: {}]  }
   0x1   :  { %v18_v0 = vld [vmem:[%s240_s0] sm:$0xf]  ;;  %151 = vmatprep.subr.mxu0 %v185_v2  ;;  %153 = vmatprep.mubr.msk.f32.mxu0 %vm186_vm1, %v185_v2 }
   0x2   :  { %v19_v1 = vld [vmem:[%s241_s1] sm:$0xff] }
   0x3   :  { %v106_v3 = vld [vmem:[%s242_s2] sm:$0xff] }
   0x4   :  { %9 = vsyncpa [#allocation3], 0  ;;  %152 = vmatpush3.msk.msra.mxu0 %vm24_vm0, %v18_v0  ;;  %v187_v4 = vmov 0   ;;  %v107_v5 = vld [vmem:[%s243_s3] sm:$0xff]  ;;  %s188_s1 = smov [#allocation2]  }
   0x5   :  { %160 = vset.pattern.permute.xlu0 %v187_v4  ;;  %154 = vmatmul.mubr.msk.f32.vlgmr.msra.gmra.mrb[0].mxu0 %vm20_vm2, %v19_v1  ;;  %s139_s2 = sshll.u32 %s188_s1, 4  ;;  %s140_s2 = int_to_ptr.vmem [resolvable:$true] %s139_s2 }
   0x6   :  { %110 = vperm.xlu0 %160, %v106_v3   ;;  %s161_s3 = scalar_lea.vmem %s140_s2, 16  ;;  %s165_s22 = scalar_lea.vmem %s140_s2, 32 }
   0x7   :  { %p162_p0 = scmp.ne.s32.totalorder %s140_s2, %s161_s3  ;;  %p166_p1 = scmp.lt.s32.totalorder %s140_s2, %s140_s2 }
   0x8   :  { %p167_p2 = scmp.lt.s32.totalorder %s165_s22, %s161_s3 }
   0xa   :  { %117 = vperm.xlu0 %160, %v107_v5   ;;  %p168_p3 = por %p167_p2, %p166_p1 }
   0xc   :  { %p169_p4 = pnand %p168_p3, %p162_p0 }
  0x85   :  { %v111_v6 = vpop.permute.xlu0 %110 }
  0x89   :  { %v118_v11 = vpop.permute.xlu0 %117 }
  0xd8   :  { %v94_v7 = vpop.f32.mrb[0].mxu0 }
  0xd9   :  { %v98_v8 = vmul.f32 %v94_v7, %v18_v0  ;;  %v114_v9 = vmul.f32 %v94_v7, %v94_v7  ;;  %v155_v10 = vpop.f32.mrb[1].mxu0  ;;  %v113_v13 = vmul.f32 %v111_v6, %v94_v7 }
  0xdb   :  { %v99_v12 = vsel %vm24_vm0, %v98_v8, 0.0  ;;  %v120_v14 = vmul.f32 %v118_v11, %v114_v9 }
  0xdc   :  { %v100_v15 = vrot.slane %v99_v12, 4 }
  0xdd   :  { %v121_v16 = vadd.f32 %v120_v14, %v113_v13 }
  0xde   :  { %v101_v17 = vadd.f32 %v100_v15, %v99_v12 }
  0xdf   :  { %v122_v18 = vrot.slane %v121_v16, 4 }
  0xe0   :  { %v102_v19 = vrot.slane %v101_v17, 2 }
  0xe1   :  { %v123_v20 = vadd.f32 %v122_v18, %v121_v16 }
  0xe2   :  { %v103_v21 = vadd.f32 %v102_v19, %v101_v17 }
  0xe3   :  { %v124_v22 = vrot.slane %v123_v20, 2 }
  0xe4   :  { %v104_v23 = vrot.slane %v103_v21, 1 }
  0xe5   :  { %v125_v24 = vadd.f32 %v124_v22, %v123_v20 }
  0xe6   :  { %v105_v25 = vadd.f32 %v104_v23, %v103_v21 }
  0xe7   :  { %v126_v26 = vrot.slane %v125_v24, 1 }
  0xe8   :  { %v128_v27 = vmul.f32 %v105_v25, %v105_v25  ;;  %v129_v28 = vmul.f32 15.0, %v105_v25 }
  0xe9   :  { %v127_v29 = vadd.f32 %v126_v26, %v125_v24 }
  0xea   :  { %v130_v30 = vadd.f32 %v129_v28, %v128_v27 }
  0xec   :  { %v131_v31 = vadd.f32 %v130_v30, %v127_v29 }
  0xee   :  { %132 = vst [vmem:[#allocation2] sm:$0x1] %v131_v31 }
  0xef   :  { %172 = shalt.err (!%p169_p4)
}
  0xf0   :  { %s173_s25 = scalar_lea.hbm %s244_s4, 16 }
  0xf1   :  { %p174_p5 = scmp.ne.s32.totalorder %s244_s4, %s173_s25  ;;  %p177_p6 = scmp.lt.u32.totalorder %s173_s25, %s244_s4 }
  0xf3   :  { %p179_p7 = pnand %p177_p6, %p174_p5 }
  0xf5   :  { %182 = shalt.err (!%p179_p7)
}
  0xf6   :  { %142 = dma.vmem_to_hbm [thread:$0]  %s140_s2, 16, %s244_s4, [#allocation3]  }
  0xf7   :  { %183 = dma.done.wait [#allocation3], 16  }
  0xf8   :  { %184 = vsyncadd [#allocation3], 4294967280 }
  0xf9   :  { %146 = vsyncpa [#allocation3], 1 }

</bundles_post_ra>
